<compile_context>
chip_gen: v7x
topology: tpu7x:2x2x1
jax: 0.10.0
libtpu: 0.0.40
codegen_flags: <defaults>
</compile_context>

<pallas_src>
import functools
import jax
import jax.numpy as jnp
from jax.experimental import pallas as pl
from jax.experimental.pallas import tpu as pltpu


def _layernorm_kernel(x_ref, g_ref, b_ref, o_ref, *, eps, inv_n, inv_nm1):
    # x_ref: (bm, F) tile; g_ref/b_ref: (1, F); o_ref: (bm, F)
    x = x_ref[...].astype(jnp.float32)

    # mean and unbiased variance via sum + static-constant scale (no VPU divides)
    mean = jnp.sum(x, axis=-1, keepdims=True) * inv_n
    diff = x - mean
    var = jnp.sum(diff * diff, axis=-1, keepdims=True) * inv_nm1
    denom = jnp.sqrt(var) + eps                       # (bm, 1), matches (std + eps)

    # Per-row reciprocal on the EUP (separate VLIW slot) + one Newton-Raphson
    # refinement -> ~f32-exact; avoids a full (bm, F) divide on the VPU.
    inv = pl.reciprocal(denom, approx=True)
    inv = inv * (2.0 - denom * inv)

    gamma = g_ref[...].astype(jnp.float32)
    beta = b_ref[...].astype(jnp.float32)
    o_ref[...] = ((diff * inv) * gamma + beta).astype(o_ref.dtype)


def layer_norm(x, gamma, beta, *, eps=1e-6, block_rows=None,
               tile_budget_bytes=16 * 1024 * 1024):
    """x: (B, F); gamma, beta: (F,).  Returns gamma*(x-mean)/(std+eps)+beta."""
    B, F = x.shape
    itemsize = jnp.dtype(x.dtype).itemsize

    # Sublane packing: 8 rows/vreg for 4-byte, 16 for 2-byte, 32 for 1-byte.
    pack = max(8, 32 // max(itemsize, 1))

    if block_rows is None:
        # Double-buffered input + output tiles: 4 * bm * F * itemsize bytes.
        # Keep that under the tile budget (safe on v7x's 64 MiB VMEM; v5e/v6e
        # have 128 MiB and could go larger, but this already amortizes the
        # per-step overhead far past the knee of the roofline curve).
        bm = max(pack, tile_budget_bytes // (4 * F * itemsize))
        bm = (bm // pack) * pack
        bm = min(bm, 2048)
    else:
        bm = block_rows
    # Never exceed the (padded-up) batch.
    bm = min(bm, ((B + pack - 1) // pack) * pack)
    bm = max(bm, pack) if B >= pack else B

    grid = (pl.cdiv(B, bm),)  # ragged tail handled by Pallas block masking

    gamma2 = gamma.reshape(1, F)
    beta2 = beta.reshape(1, F)

    # TODO(synk): F == 1 gives NaN in torch (unbiased std of one element); we
    # guard the trace-time division only.
    inv_nm1 = 1.0 / float(max(F - 1, 1))

    kernel = functools.partial(
        _layernorm_kernel,
        eps=float(eps),                 # static Python floats -> no captured tracers
        inv_n=1.0 / float(F),
        inv_nm1=inv_nm1,
    )

    # Explicit scoped-VMEM limit covering double-buffered in/out tiles + params.
    tiles_bytes = 4 * bm * F * itemsize + 4 * F * 4
    vmem_limit = int(min(max(tiles_bytes + (8 << 20), 16 << 20), 48 << 20))

    cost = pl.CostEstimate(
        flops=5 * B * F,
        transcendentals=2 * B,                      # sqrt + reciprocal per row
        bytes_accessed=2 * B * F * itemsize + 2 * F * 4,
    )

    return pl.pallas_call(
        kernel,
        out_shape=jax.ShapeDtypeStruct((B, F), x.dtype),
        grid_spec=pltpu.PrefetchScalarGridSpec(
            num_scalar_prefetch=0,
            grid=grid,
            in_specs=[
                pl.BlockSpec((bm, F), lambda i: (i, 0)),   # x tile
                pl.BlockSpec((1, F), lambda i: (0, 0)),    # gamma (broadcast)
                pl.BlockSpec((1, F), lambda i: (0, 0)),    # beta (broadcast)
            ],
            out_specs=pl.BlockSpec((bm, F), lambda i: (i, 0)),
        ),
        compiler_params=pltpu.CompilerParams(
            dimension_semantics=("parallel",),             # megacore split on v7x
            vmem_limit_bytes=vmem_limit,
        ),
        cost_estimate=cost,
    )(x, gamma2, beta2)


def layer_norm_ref(x, gamma, beta, eps=1e-6):
    x32 = x.astype(jnp.float32)
    mean = jnp.mean(x32, axis=-1, keepdims=True)
    std = jnp.std(x32, axis=-1, keepdims=True, ddof=1)  # unbiased, like torch.std
    return (gamma * (x32 - mean) / (std + eps) + beta).astype(x.dtype)


if __name__ == "__main__":
    key = jax.random.PRNGKey(0)
    B, F = 8, 32  # e.g. DDPG hidden activations: (batch, hidden)
    x = jax.random.normal(key, (B, F), dtype=jnp.float32)

    # Parameters initialized deterministically as in the module's __init__:
    gamma = jnp.ones((F,), dtype=jnp.float32)
    beta = jnp.zeros((F,), dtype=jnp.float32)

    out = layer_norm(x, gamma, beta, eps=1e-6)
    out = jax.block_until_ready(out)

    ref = layer_norm_ref(x, gamma, beta, eps=1e-6)
    assert out.shape == x.shape and out.dtype == x.dtype
    assert jnp.allclose(out, ref, atol=1e-5, rtol=1e-5), "mismatch vs reference"

    print("KERNEL_OK")
</pallas_src>

<mosaic_0001>
module attributes {stable_mosaic.version = 11 : i64} {
  func.func @_layernorm_kernel(%arg0: i32, %arg1: memref<8x32xf32, #tpu.memory_space<vmem>>, %arg2: memref<1x32xf32, #tpu.memory_space<vmem>>, %arg3: memref<1x32xf32, #tpu.memory_space<vmem>>, %arg4: memref<8x32xf32, #tpu.memory_space<vmem>>) attributes {dimension_semantics = [#tpu.dimension_semantics<parallel>], iteration_bounds = array<i64: 1>, scalar_prefetch = 0 : i64, scratch_operands = 0 : i64, tpu.core_type = #tpu.core_type<tc>, window_params = [{transform_indices = @transform_0, window_bounds = array<i64: 8, 32>}, {pipeline_mode = #tpu.pipeline_mode<synchronous>, transform_indices = @transform_1, window_bounds = array<i64: 1, 32>}, {pipeline_mode = #tpu.pipeline_mode<synchronous>, transform_indices = @transform_2, window_bounds = array<i64: 1, 32>}, {transform_indices = @transform_3, window_bounds = array<i64: 8, 32>}]} {
    %c0 = arith.constant 0 : index
    %c0_0 = arith.constant 0 : index
    %0 = vector.load %arg1[%c0, %c0_0] : memref<8x32xf32, #tpu.memory_space<vmem>>, vector<8x32xf32>
    %cst = arith.constant dense<0.000000e+00> : vector<8xf32>
    %1 = vector.multi_reduction <add>, %0, %cst [1] : vector<8x32xf32> to vector<8xf32>
    %2 = vector.shape_cast %1 : vector<8xf32> to vector<8x1xf32>
    %cst_1 = arith.constant 3.125000e-02 : f32
    %3 = vector.broadcast %cst_1 : f32 to vector<8x1xf32>
    %4 = arith.mulf %2, %3 : vector<8x1xf32>
    %5 = vector.broadcast %4 : vector<8x1xf32> to vector<8x32xf32>
    %6 = arith.subf %0, %5 : vector<8x32xf32>
    %7 = arith.mulf %6, %6 : vector<8x32xf32>
    %cst_2 = arith.constant dense<0.000000e+00> : vector<8xf32>
    %8 = vector.multi_reduction <add>, %7, %cst_2 [1] : vector<8x32xf32> to vector<8xf32>
    %9 = vector.shape_cast %8 : vector<8xf32> to vector<8x1xf32>
    %cst_3 = arith.constant 0.0322580636 : f32
    %10 = vector.broadcast %cst_3 : f32 to vector<8x1xf32>
    %11 = arith.mulf %9, %10 : vector<8x1xf32>
    %12 = math.sqrt %11 : vector<8x1xf32>
    %cst_4 = arith.constant 9.99999997E-7 : f32
    %13 = vector.broadcast %cst_4 : f32 to vector<8x1xf32>
    %14 = arith.addf %12, %13 : vector<8x1xf32>
    %15 = tpu.reciprocal %14 {approx = true} : vector<8x1xf32> -> vector<8x1xf32>
    %16 = arith.mulf %14, %15 : vector<8x1xf32>
    %cst_5 = arith.constant 2.000000e+00 : f32
    %17 = vector.broadcast %cst_5 : f32 to vector<8x1xf32>
    %18 = arith.subf %17, %16 : vector<8x1xf32>
    %19 = arith.mulf %15, %18 : vector<8x1xf32>
    %c0_6 = arith.constant 0 : index
    %c0_7 = arith.constant 0 : index
    %20 = vector.load %arg2[%c0_6, %c0_7] : memref<1x32xf32, #tpu.memory_space<vmem>>, vector<1x32xf32>
    %c0_8 = arith.constant 0 : index
    %c0_9 = arith.constant 0 : index
    %21 = vector.load %arg3[%c0_8, %c0_9] : memref<1x32xf32, #tpu.memory_space<vmem>>, vector<1x32xf32>
    %22 = vector.broadcast %19 : vector<8x1xf32> to vector<8x32xf32>
    %23 = arith.mulf %6, %22 : vector<8x32xf32>
    %24 = vector.broadcast %20 : vector<1x32xf32> to vector<8x32xf32>
    %25 = arith.mulf %23, %24 : vector<8x32xf32>
    %26 = vector.broadcast %21 : vector<1x32xf32> to vector<8x32xf32>
    %27 = arith.addf %25, %26 : vector<8x32xf32>
    %c0_10 = arith.constant 0 : index
    %c0_11 = arith.constant 0 : index
    %28 = vector.load %arg4[%c0_10, %c0_11] : memref<8x32xf32, #tpu.memory_space<vmem>>, vector<8x32xf32>
    tpu.vector_store %arg4[%c0_10, %c0_11], %27 {strides = array<i32>} : memref<8x32xf32, #tpu.memory_space<vmem>>, vector<8x32xf32>,
    return
  }
  func.func @transform_0(%arg0: i32) -> (i32, i32) {
    %c0_i32 = arith.constant 0 : i32
    %c0_i32_0 = arith.constant 0 : i32
    return %arg0, %c0_i32 : i32, i32
  }
  func.func @transform_1(%arg0: i32) -> (i32, i32) {
    %c0_i32 = arith.constant 0 : i32
    %c0_i32_0 = arith.constant 0 : i32
    %c0_i32_1 = arith.constant 0 : i32
    return %c0_i32, %c0_i32_0 : i32, i32
  }
  func.func @transform_2(%arg0: i32) -> (i32, i32) {
    %c0_i32 = arith.constant 0 : i32
    %c0_i32_0 = arith.constant 0 : i32
    %c0_i32_1 = arith.constant 0 : i32
    return %c0_i32, %c0_i32_0 : i32, i32
  }
  func.func @transform_3(%arg0: i32) -> (i32, i32) {
    %c0_i32 = arith.constant 0 : i32
    %c0_i32_0 = arith.constant 0 : i32
    return %arg0, %c0_i32 : i32, i32
  }
}

</mosaic_0001>

<bundles_post_ra>
// kernel: tpu_custom_call.1
= control target key start
LH: loop header
LB: loop body
LE: loop exit
PB: predicated region body
PF: predicated region fallthrough
CT: control target
= control target key end

     0   :  { %8 = vsyncpa [#allocation3], 0  ;;  %s195_s0 = inlined_call_operand.hbm [shape: f32[8,32], index: 0, kind: input, shape index: {}]   ;;  %s196_s1 = inlined_call_operand.vmem [shape: f32[1,32], index: 1, kind: input, shape index: {}]   ;;  %s197_s2 = inlined_call_operand.vmem [shape: f32[1,32], index: 2, kind: input, shape index: {}]   ;;  %s198_s3 = inlined_call_operand.hbm [shape: f32[8,32], index: 3, kind: output, shape index: {}]  }
   0x1   :  { %9 = vsyncpa [#allocation4], 0  ;;  %s140_s12 = smov [#allocation2]   ;;  %s92_s16 = scalar_lea.hbm %s195_s0, 128 }
   0x2   :  { %s16_s13 = sshll.u32 %s140_s12, 4  ;;  %p93_p0 = scmp.ne.s32.totalorder %s195_s0, %s92_s16  ;;  %s17_s13 = int_to_ptr.vmem [resolvable:$true] %s16_s13 }
   0x3   :  { %p96_p1 = scmp.lt.u32.totalorder %s92_s16, %s195_s0 }
   0x5   :  { %p98_p2 = pnand %p96_p1, %p93_p0 }
   0x7   :  { %101 = shalt.err (!%p98_p2)
}
   0x8   :  { %s102_s21 = scalar_lea.vmem %s17_s13, 128  ;;  %p107_p4 = scmp.lt.s32.totalorder %s17_s13, %s17_s13 }
   0x9   :  { %p103_p3 = scmp.ne.s32.totalorder %s17_s13, %s102_s21  ;;  %p108_p5 = scmp.lt.s32.totalorder %s102_s21, %s102_s21 }
   0xb   :  { %p109_p6 = por %p108_p5, %p107_p4 }
   0xd   :  { %p110_p7 = pnand %p109_p6, %p103_p3 }
   0xf   :  { %113 = shalt.err (!%p110_p7)
}
  0x10   :  { %19 = dma.hbm_to_vmem [thread:$0]  %s195_s0, 128, %s17_s13, [#allocation3]  }
  0x11   :  { %136 = dma.done.wait [#allocation3], 128  }
  0x12   :  { %137 = vsyncadd [#allocation3], 4294967168  ;;  %vm28_vm0 = vcmask 261120   ;;  %v27_v0 = vld [vmem:[#allocation2] sm:$0xff]  ;;  %s141_s27 = smov [#allocation5]  }
  0x13   :  { %v29_v1 = vsel %vm28_vm0, %v27_v0, 0.0  ;;  %v84_v19 = vld [vmem:[%s196_s1] ss:$0 sm:$0xff]  ;;  %s75_s28 = sshll.u32 %s141_s27, 4  ;;  %s76_s28 = int_to_ptr.vmem [resolvable:$true] %s75_s28 }
  0x14   :  { %30 = vadd.xlane.f32.xlu0 %v29_v1  ;;  %v85_v21 = vld [vmem:[%s197_s2] ss:$0 sm:$0xff]  ;;  %s114_s29 = scalar_lea.vmem %s76_s28, 128  ;;  %p119_p9 = scmp.lt.s32.totalorder %s76_s28, %s76_s28 }
  0x15   :  { %p115_p8 = scmp.ne.s32.totalorder %s76_s28, %s114_s29  ;;  %p120_p10 = scmp.lt.s32.totalorder %s114_s29, %s114_s29 }
  0x17   :  { %p121_p11 = por %p120_p10, %p119_p9 }
  0x19   :  { %p122_p12 = pnand %p121_p11, %p115_p8 }
  0xa1   :  { %v31_v2 = vpop.xlane.xlu0 %30 }
  0xa2   :  { %v32_v3 = vmul.f32 0.03125, %v31_v2 }
  0xa4   :  { %v33_v4 = vsub.f32 %v27_v0, %v32_v3 }
  0xa6   :  { %v34_v5 = vmul.f32 %v33_v4, %v33_v4 }
  0xa8   :  { %v35_v6 = vsel %vm28_vm0, %v34_v5, 0.0 }
  0xa9   :  { %36 = vadd.xlane.f32.xlu0 %v35_v6 }
 0x136   :  { %v37_v7 = vpop.xlane.xlu0 %36 }
 0x137   :  { %v38_v8 = vmul.f32 0.032258064, %v37_v7 }
 0x139   :  { %88 = vrsqrt.f32 %v38_v8  ;;  %vm41_vm1 = vcmp.eq.f32.partialorder %v38_v8, inf  ;;  %v44_v11 = vand.u32 2147483648, %v38_v8  ;;  %vm43_vm2 = vcmp.eq.f32.partialorder %v38_v8, 0.0 }
 0x143   :  { %v89_v9 = vpop.eup %88 }
 0x144   :  { %v40_v10 = vmul.f32 %v89_v9, %v38_v8 }
 0x146   :  { %v42_v12 = vsel %vm41_vm1, %v38_v8, %v40_v10 }
 0x147   :  { %v45_v13 = vsel %vm43_vm2, %v44_v11, %v42_v12 }
 0x148   :  { %v46_v14 = vadd.f32 1e-06, %v45_v13 }
 0x14a   :  { %90 = vrcp.f32 %v46_v14 }
 0x154   :  { %v91_v15 = vpop.eup %90 }
 0x155   :  { %v48_v16 = vmul.f32 %v91_v15, %v46_v14 }
 0x157   :  { %v49_v17 = vsub.f32 2.0, %v48_v16 }
 0x159   :  { %v50_v18 = vmul.f32 %v91_v15, %v49_v17 }
 0x15b   :  { %v53_v20 = vmul.f32 %v50_v18, %v33_v4 }
 0x15d   :  { %v60_v22 = vmul.f32 %v84_v19, %v53_v20 }
 0x15f   :  { %v67_v23 = vadd.f32 %v85_v21, %v60_v22 }
 0x161   :  { %68 = vst.msk [vmem:[#allocation5] sm:$0xff] %vm28_vm0, %v67_v23 }
 0x162   :  { %125 = shalt.err (!%p122_p12)
}
 0x163   :  { %s126_s4 = scalar_lea.hbm %s198_s3, 128 }
 0x164   :  { %p127_p13 = scmp.ne.s32.totalorder %s198_s3, %s126_s4  ;;  %p130_p0 = scmp.lt.u32.totalorder %s126_s4, %s198_s3 }
 0x166   :  { %p132_p1 = pnand %p130_p0, %p127_p13 }
 0x168   :  { %135 = shalt.err (!%p132_p1)
}
 0x169   :  { %78 = dma.vmem_to_hbm [thread:$0]  %s76_s28, 128, %s198_s3, [#allocation4]  }
 0x16a   :  { %138 = dma.done.wait [#allocation4], 128  }
 0x16b   :  { %139 = vsyncadd [#allocation4], 4294967168 }
 0x16c   :  { %82 = vsyncpa [#allocation3], 1 }
 0x16d   :  { %83 = vsyncpa [#allocation4], 1 }

</bundles_post_ra>
